<compile_context>
chip_gen: v5e
topology: v5e:2x2
jax: 0.10.0
libtpu: 0.0.40
codegen_flags: <defaults>
</compile_context>

<pallas_src>
import functools

import numpy as np

import jax
import jax.numpy as jnp
from jax import lax
from jax.experimental import pallas as pl
from jax.experimental.pallas import tpu as pltpu


# ---------------------------------------------------------------------------
# Pallas kernel
# ---------------------------------------------------------------------------
def _dual_attention_kernel(shifts,
                           x_ref, masks_ref,
                           w_ca_ref, b_ca_ref,
                           w_sa1_ref, b_sa1_ref,
                           w_sa2_ref, b_sa2_ref,
                           w_sa3_ref, b_sa3_ref,
                           out_ref):
    bblk = x_ref.shape[0]

    # Hoist weight / mask loads out of the per-image loop.
    w_ca, b_ca = w_ca_ref[...], b_ca_ref[...]
    w_sa1, b_sa1 = w_sa1_ref[...], b_sa1_ref[...]
    w_sa2, b_sa2 = w_sa2_ref[...], b_sa2_ref[...]
    w_sa3, b_sa3 = w_sa3_ref[...], b_sa3_ref[...]
    tap_masks = [masks_ref[k:k + 1, :] for k in range(9)]        # 9 x (1, HW)

    def dilated_conv(feat, w_fused, bias):
        # feat: (CRP, HW).  Build the 9 shifted taps with lane rolls (XLU) and
        # zero-padding border masks, stack them along the contraction dim and
        # hit them with ONE MXU matmul: (Cout, 9*CRP) @ (9*CRP, HW).
        taps = []
        for k in range(9):
            if shifts[k] == 0:             # centre tap: no shift, no border
                taps.append(feat)
            else:
                t = pltpu.roll(feat, shifts[k], axis=1)
                taps.append(t * tap_masks[k])
        stacked = jnp.concatenate(taps, axis=0)                  # (9*CRP, HW)
        return jnp.dot(w_fused, stacked,
                       preferred_element_type=jnp.float32) + bias

    for bb in range(bblk):                                       # static unroll
        x2d = x_ref[bb].astype(jnp.float32)                      # (C, HW)

        # Channel attention (ca_conv1 o ca_conv2 pre-folded on the host).
        pooled = jnp.mean(x2d, axis=1, keepdims=True)            # (C, 1)
        ca = jnp.dot(w_ca, pooled,
                     preferred_element_type=jnp.float32) + b_ca  # (C, 1)

        # Spatial attention: 1x1 -> dilated 3x3 -> dilated 3x3 (+ folded 1x1).
        sa = jnp.dot(w_sa1, x2d,
                     preferred_element_type=jnp.float32) + b_sa1  # (CRP, HW)
        sa = dilated_conv(sa, w_sa2, b_sa2)                       # (CRP, HW)
        sa = dilated_conv(sa, w_sa3, b_sa3)                       # (1, HW)

        # attn = sigmoid(ca broadcast over space + sa broadcast over channels)
        attn = jax.nn.sigmoid(ca + sa)                            # (C, HW)
        out_ref[bb] = (attn * x2d + x2d).astype(out_ref.dtype)


# ---------------------------------------------------------------------------
# Host-side helpers
# ---------------------------------------------------------------------------
def _make_tap_masks(H, W, dilation):
    """(9, H*W) float masks: 1 where the dilated tap lands inside the image."""
    hh = np.arange(H)[:, None]
    ww = np.arange(W)[None, :]
    masks = []
    for ky in range(3):
        for kx in range(3):
            dy = (ky - 1) * dilation
            dx = (kx - 1) * dilation
            valid = ((hh + dy >= 0) & (hh + dy < H) &
                     (ww + dx >= 0) & (ww + dx < W))
            masks.append(valid.reshape(-1).astype(np.float32))
    return jnp.asarray(np.stack(masks))


def dual_attention_pallas(x_nchw, params, dilation=4, batch_block=None):
    B, C, H, W = x_nchw.shape
    HW = H * W

    if batch_block is None:
        # Keep >= 2 parallel grid steps when possible (v7x: 2 TensorCores).
        # On single-TC chips (v5e/v6e) pass a larger batch_block to amortize
        # the ~0.35us per-grid-step overhead.
        batch_block = 1 if B % 2 == 0 else B
    assert B % batch_block == 0, "batch must be divisible by batch_block"

    x = x_nchw.reshape(B, C, HW)          # free row-major view of NCHW

    # Static lane-roll amounts for the 9 dilated taps (jnp.roll convention).
    shifts = []
    for ky in range(3):
        for kx in range(3):
            s = (ky - 1) * dilation * W + (kx - 1) * dilation
            shifts.append((-s) % HW)
    shifts = tuple(shifts)
    tap_masks = _make_tap_masks(H, W, dilation)                  # (9, HW)

    kernel = functools.partial(_dual_attention_kernel, shifts)

    def full2d(arr):
        return pl.BlockSpec(arr.shape, lambda b: (0, 0))

    in_specs = [
        pl.BlockSpec((batch_block, C, HW), lambda b: (b, 0, 0)),   # x
        full2d(tap_masks),
        full2d(params["w_ca"]), full2d(params["b_ca"]),
        full2d(params["w_sa1"]), full2d(params["b_sa1"]),
        full2d(params["w_sa2"]), full2d(params["b_sa2"]),
        full2d(params["w_sa3"]), full2d(params["b_sa3"]),
    ]

    out = pl.pallas_call(
        kernel,
        out_shape=jax.ShapeDtypeStruct((B, C, HW), x.dtype),
        grid=(B // batch_block,),
        in_specs=in_specs,
        out_specs=pl.BlockSpec((batch_block, C, HW), lambda b: (b, 0, 0)),
        compiler_params=pltpu.CompilerParams(
            dimension_semantics=("parallel",)),
    )(x, tap_masks,
      params["w_ca"], params["b_ca"],
      params["w_sa1"], params["b_sa1"],
      params["w_sa2"], params["b_sa2"],
      params["w_sa3"], params["b_sa3"])

    return out.reshape(B, C, H, W)        # free view back to NCHW


def init_params(key, in_channels, reduction_ratio=16):
    """Kaiming-normal (fan_in) conv weights, zero biases (matches __init__)."""
    CR = in_channels // reduction_ratio
    keys = jax.random.split(key, 6)

    def kaiming(k, out_c, in_c, kh=1, kw=1):
        fan_in = in_c * kh * kw
        std = (2.0 / fan_in) ** 0.5
        return jax.random.normal(k, (out_c, in_c, kh, kw), jnp.float32) * std

    return {
        "ca1": kaiming(keys[0], CR, in_channels),
        "ca2": kaiming(keys[1], in_channels, CR),
        "sa1": kaiming(keys[2], CR, in_channels),
        "sa2": kaiming(keys[3], CR, CR, 3, 3),
        "sa3": kaiming(keys[4], CR, CR, 3, 3),
        "sa4": kaiming(keys[5], 1, CR),
        "b_ca1": jnp.zeros((CR,), jnp.float32),
        "b_ca2": jnp.zeros((in_channels,), jnp.float32),
        "b_sa1": jnp.zeros((CR,), jnp.float32),
        "b_sa2": jnp.zeros((CR,), jnp.float32),
        "b_sa3": jnp.zeros((CR,), jnp.float32),
        "b_sa4": jnp.zeros((1,), jnp.float32),
    }


def pack_params(oihw):
    """Fold the linear chains and pad CR->CRP=8 (exact: module has no activations)."""
    ca1 = oihw["ca1"][:, :, 0, 0]            # (CR, C)
    ca2 = oihw["ca2"][:, :, 0, 0]            # (C, CR)
    sa1 = oihw["sa1"][:, :, 0, 0]            # (CR, C)
    sa4 = oihw["sa4"][:, :, 0, 0]            # (1, CR)
    CR, C = sa1.shape
    CRP = max(8, ((CR + 7) // 8) * 8)

    # Channel attention: conv2(conv1(pooled)) -> one (C, C) matmul + bias.
    w_ca = ca2 @ ca1
    b_ca = (ca2 @ oihw["b_ca1"] + oihw["b_ca2"]).reshape(C, 1)

    # sa_conv1, padded to CRP rows.
    w_sa1 = jnp.zeros((CRP, C), jnp.float32).at[:CR].set(sa1)
    b_sa1 = jnp.zeros((CRP, 1), jnp.float32).at[:CR, 0].set(oihw["b_sa1"])

    def fuse_taps(w_oihw, out_rows):
        # (O, I, 3, 3) -> (out_rows, 9*CRP) with tap k = ky*3+kx in column
        # block [k*CRP : k*CRP+I]; padded slots stay exactly zero.
        O, I = w_oihw.shape[:2]
        w = jnp.zeros((out_rows, 9 * CRP), jnp.float32)
        for ky in range(3):
            for kx in range(3):
                k = ky * 3 + kx
                w = w.at[:O, k * CRP:k * CRP + I].set(w_oihw[:, :, ky, kx])
        return w

    w_sa2 = fuse_taps(oihw["sa2"], CRP)                          # (CRP, 9*CRP)
    b_sa2 = jnp.zeros((CRP, 1), jnp.float32).at[:CR, 0].set(oihw["b_sa2"])

    # sa_conv3 folded with sa_conv4 (CR -> 1).
    sa3_folded = jnp.einsum("om,mikl->oikl", sa4, oihw["sa3"])   # (1, CR, 3, 3)
    w_sa3 = fuse_taps(sa3_folded, 1)                             # (1, 9*CRP)
    b_sa3 = (sa4 @ oihw["b_sa3"] + oihw["b_sa4"]).reshape(1, 1)

    return dict(w_ca=w_ca, b_ca=b_ca,
                w_sa1=w_sa1, b_sa1=b_sa1,
                w_sa2=w_sa2, b_sa2=b_sa2,
                w_sa3=w_sa3, b_sa3=b_sa3)


# ---------------------------------------------------------------------------
# Pure-JAX reference (mirrors the PyTorch forward)
# ---------------------------------------------------------------------------
def dual_attention_ref(x, p, dilation=4):
    def conv1x1(y, w, b):
        return jnp.einsum("bchw,oc->bohw", y, w[:, :, 0, 0]) + b[None, :, None, None]

    ca = jnp.mean(x, axis=(2, 3), keepdims=True)
    ca = conv1x1(ca, p["ca1"], p["b_ca1"])
    ca = conv1x1(ca, p["ca2"], p["b_ca2"])

    dn = ("NCHW", "OIHW", "NCHW")
    pad = ((dilation, dilation), (dilation, dilation))
    sa = conv1x1(x, p["sa1"], p["b_sa1"])
    sa = lax.conv_general_dilated(sa, p["sa2"], (1, 1), pad,
                                  rhs_dilation=(dilation, dilation),
                                  dimension_numbers=dn) + p["b_sa2"][None, :, None, None]
    sa = lax.conv_general_dilated(sa, p["sa3"], (1, 1), pad,
                                  rhs_dilation=(dilation, dilation),
                                  dimension_numbers=dn) + p["b_sa3"][None, :, None, None]
    sa = conv1x1(sa, p["sa4"], p["b_sa4"])

    attn = jax.nn.sigmoid(ca + sa)          # broadcast over space (ca) / channels (sa)
    return attn * x + x


if __name__ == "__main__":
    key = jax.random.PRNGKey(0)
    kx, kp = jax.random.split(key)

    B, C, H, W = 2, 32, 16, 16              # in_channels=32, reduction=16 -> CR=2
    DILATION = 4

    x = jax.random.normal(kx, (B, C, H, W), jnp.float32)
    oihw = init_params(kp, C, reduction_ratio=16)
    params = pack_params(oihw)

    out = dual_attention_pallas(x, params, dilation=DILATION)
    out = jax.block_until_ready(out)

    ref = dual_attention_ref(x, oihw, dilation=DILATION)
    assert out.shape == x.shape
    err = jnp.max(jnp.abs(out - ref))
    if not jnp.allclose(out, ref, atol=2e-4, rtol=2e-4):
        raise AssertionError(f"mismatch vs reference, max abs err = {err}")

    print("KERNEL_OK")
</pallas_src>

<mosaic_0001>
module attributes {stable_mosaic.version = 11 : i64} {
  func.func @_dual_attention_kernel(%arg0: i32, %arg1: memref<1x32x256xf32, #tpu.memory_space<vmem>>, %arg2: memref<9x256xf32, #tpu.memory_space<vmem>>, %arg3: memref<32x32xf32, #tpu.memory_space<vmem>>, %arg4: memref<32x1xf32, #tpu.memory_space<vmem>>, %arg5: memref<8x32xf32, #tpu.memory_space<vmem>>, %arg6: memref<8x1xf32, #tpu.memory_space<vmem>>, %arg7: memref<8x72xf32, #tpu.memory_space<vmem>>, %arg8: memref<8x1xf32, #tpu.memory_space<vmem>>, %arg9: memref<1x72xf32, #tpu.memory_space<vmem>>, %arg10: memref<1x1xf32, #tpu.memory_space<vmem>>, %arg11: memref<1x32x256xf32, #tpu.memory_space<vmem>>) attributes {dimension_semantics = [#tpu.dimension_semantics<parallel>], iteration_bounds = array<i64: 2>, scalar_prefetch = 0 : i64, scratch_operands = 0 : i64, tpu.core_type = #tpu.core_type<tc>, window_params = [{transform_indices = @transform_0, window_bounds = array<i64: 1, 32, 256>}, {pipeline_mode = #tpu.pipeline_mode<synchronous>, transform_indices = @transform_1, window_bounds = array<i64: 9, 256>}, {pipeline_mode = #tpu.pipeline_mode<synchronous>, transform_indices = @transform_2, window_bounds = array<i64: 32, 32>}, {pipeline_mode = #tpu.pipeline_mode<synchronous>, transform_indices = @transform_3, window_bounds = array<i64: 32, 1>}, {pipeline_mode = #tpu.pipeline_mode<synchronous>, transform_indices = @transform_4, window_bounds = array<i64: 8, 32>}, {pipeline_mode = #tpu.pipeline_mode<synchronous>, transform_indices = @transform_5, window_bounds = array<i64: 8, 1>}, {pipeline_mode = #tpu.pipeline_mode<synchronous>, transform_indices = @transform_6, window_bounds = array<i64: 8, 72>}, {pipeline_mode = #tpu.pipeline_mode<synchronous>, transform_indices = @transform_7, window_bounds = array<i64: 8, 1>}, {pipeline_mode = #tpu.pipeline_mode<synchronous>, transform_indices = @transform_8, window_bounds = array<i64: 1, 72>}, {pipeline_mode = #tpu.pipeline_mode<synchronous>, transform_indices = @transform_9, window_bounds = array<i64: 1, 1>}, {transform_indices = @transform_10, window_bounds = array<i64: 1, 32, 256>}]} {
    %c0 = arith.constant 0 : index
    %c0_0 = arith.constant 0 : index
    %0 = vector.load %arg3[%c0, %c0_0] : memref<32x32xf32, #tpu.memory_space<vmem>>, vector<32x32xf32>
    %c0_1 = arith.constant 0 : index
    %c0_2 = arith.constant 0 : index
    %1 = vector.load %arg4[%c0_1, %c0_2] : memref<32x1xf32, #tpu.memory_space<vmem>>, vector<32x1xf32>
    %c0_3 = arith.constant 0 : index
    %c0_4 = arith.constant 0 : index
    %2 = vector.load %arg5[%c0_3, %c0_4] : memref<8x32xf32, #tpu.memory_space<vmem>>, vector<8x32xf32>
    %c0_5 = arith.constant 0 : index
    %c0_6 = arith.constant 0 : index
    %3 = vector.load %arg6[%c0_5, %c0_6] : memref<8x1xf32, #tpu.memory_space<vmem>>, vector<8x1xf32>
    %c0_7 = arith.constant 0 : index
    %c0_8 = arith.constant 0 : index
    %4 = vector.load %arg7[%c0_7, %c0_8] : memref<8x72xf32, #tpu.memory_space<vmem>>, vector<8x72xf32>
    %c0_9 = arith.constant 0 : index
    %c0_10 = arith.constant 0 : index
    %5 = vector.load %arg8[%c0_9, %c0_10] : memref<8x1xf32, #tpu.memory_space<vmem>>, vector<8x1xf32>
    %c0_11 = arith.constant 0 : index
    %c0_12 = arith.constant 0 : index
    %6 = vector.load %arg9[%c0_11, %c0_12] : memref<1x72xf32, #tpu.memory_space<vmem>>, vector<1x72xf32>
    %c0_13 = arith.constant 0 : index
    %c0_14 = arith.constant 0 : index
    %7 = vector.load %arg10[%c0_13, %c0_14] : memref<1x1xf32, #tpu.memory_space<vmem>>, vector<1x1xf32>
    %c0_15 = arith.constant 0 : index
    %c0_16 = arith.constant 0 : index
    %8 = vector.load %arg2[%c0_15, %c0_16] : memref<9x256xf32, #tpu.memory_space<vmem>>, vector<1x256xf32>
    %c1 = arith.constant 1 : index
    %c0_17 = arith.constant 0 : index
    %9 = vector.load %arg2[%c1, %c0_17] : memref<9x256xf32, #tpu.memory_space<vmem>>, vector<1x256xf32>
    %c2 = arith.constant 2 : index
    %c0_18 = arith.constant 0 : index
    %10 = vector.load %arg2[%c2, %c0_18] : memref<9x256xf32, #tpu.memory_space<vmem>>, vector<1x256xf32>
    %c3 = arith.constant 3 : index
    %c0_19 = arith.constant 0 : index
    %11 = vector.load %arg2[%c3, %c0_19] : memref<9x256xf32, #tpu.memory_space<vmem>>, vector<1x256xf32>
    %c5 = arith.constant 5 : index
    %c0_20 = arith.constant 0 : index
    %12 = vector.load %arg2[%c5, %c0_20] : memref<9x256xf32, #tpu.memory_space<vmem>>, vector<1x256xf32>
    %c6 = arith.constant 6 : index
    %c0_21 = arith.constant 0 : index
    %13 = vector.load %arg2[%c6, %c0_21] : memref<9x256xf32, #tpu.memory_space<vmem>>, vector<1x256xf32>
    %c7 = arith.constant 7 : index
    %c0_22 = arith.constant 0 : index
    %14 = vector.load %arg2[%c7, %c0_22] : memref<9x256xf32, #tpu.memory_space<vmem>>, vector<1x256xf32>
    %c8 = arith.constant 8 : index
    %c0_23 = arith.constant 0 : index
    %15 = vector.load %arg2[%c8, %c0_23] : memref<9x256xf32, #tpu.memory_space<vmem>>, vector<1x256xf32>
    %c0_24 = arith.constant 0 : index
    %c0_25 = arith.constant 0 : index
    %c0_26 = arith.constant 0 : index
    %16 = vector.load %arg1[%c0_24, %c0_25, %c0_26] : memref<1x32x256xf32, #tpu.memory_space<vmem>>, vector<1x32x256xf32>
    %17 = vector.shape_cast %16 : vector<1x32x256xf32> to vector<32x256xf32>
    %cst = arith.constant dense<0.000000e+00> : vector<32xf32>
    %18 = vector.multi_reduction <add>, %17, %cst [1] : vector<32x256xf32> to vector<32xf32>
    %19 = vector.shape_cast %18 : vector<32xf32> to vector<32x1xf32>
    %cst_27 = arith.constant 2.560000e+02 : f32
    %20 = vector.broadcast %cst_27 : f32 to vector<32x1xf32>
    %21 = arith.divf %19, %20 : vector<32x1xf32>
    %cst_28 = arith.constant dense<0.000000e+00> : vector<32x1xf32>
    %22 = tpu.matmul %0, %21, %cst_28 {dimension_numbers = #tpu.dot_dimension_numbers<[1], [0], [0], [1], [0, 0, 1, 1], [], []>} : vector<32x32xf32>, vector<32x1xf32>, vector<32x1xf32> -> vector<32x1xf32>
    %23 = arith.addf %22, %1 : vector<32x1xf32>
    %cst_29 = arith.constant dense<0.000000e+00> : vector<8x256xf32>
    %24 = tpu.matmul %2, %17, %cst_29 {dimension_numbers = #tpu.dot_dimension_numbers<[1], [0], [0], [1], [0, 0, 1, 1], [], []>} : vector<8x32xf32>, vector<32x256xf32>, vector<8x256xf32> -> vector<8x256xf32>
    %25 = vector.broadcast %3 : vector<8x1xf32> to vector<8x256xf32>
    %26 = arith.addf %24, %25 : vector<8x256xf32>
    %c68_i32 = arith.constant 68 : i32
    %27 = tpu.dynamic_rotate %26 by %c68_i32 dim 1 : vector<8x256xf32>, i32 -> vector<8x256xf32>
    %28 = vector.broadcast %8 : vector<1x256xf32> to vector<8x256xf32>
    %29 = arith.mulf %27, %28 : vector<8x256xf32>
    %c64_i32 = arith.constant 64 : i32
    %30 = tpu.dynamic_rotate %26 by %c64_i32 dim 1 : vector<8x256xf32>, i32 -> vector<8x256xf32>
    %31 = vector.broadcast %9 : vector<1x256xf32> to vector<8x256xf32>
    %32 = arith.mulf %30, %31 : vector<8x256xf32>
    %c60_i32 = arith.constant 60 : i32
    %33 = tpu.dynamic_rotate %26 by %c60_i32 dim 1 : vector<8x256xf32>, i32 -> vector<8x256xf32>
    %34 = vector.broadcast %10 : vector<1x256xf32> to vector<8x256xf32>
    %35 = arith.mulf %33, %34 : vector<8x256xf32>
    %c4_i32 = arith.constant 4 : i32
    %36 = tpu.dynamic_rotate %26 by %c4_i32 dim 1 : vector<8x256xf32>, i32 -> vector<8x256xf32>
    %37 = vector.broadcast %11 : vector<1x256xf32> to vector<8x256xf32>
    %38 = arith.mulf %36, %37 : vector<8x256xf32>
    %c252_i32 = arith.constant 252 : i32
    %39 = tpu.dynamic_rotate %26 by %c252_i32 dim 1 : vector<8x256xf32>, i32 -> vector<8x256xf32>
    %40 = vector.broadcast %12 : vector<1x256xf32> to vector<8x256xf32>
    %41 = arith.mulf %39, %40 : vector<8x256xf32>
    %c196_i32 = arith.constant 196 : i32
    %42 = tpu.dynamic_rotate %26 by %c196_i32 dim 1 : vector<8x256xf32>, i32 -> vector<8x256xf32>
    %43 = vector.broadcast %13 : vector<1x256xf32> to vector<8x256xf32>
    %44 = arith.mulf %42, %43 : vector<8x256xf32>
    %c192_i32 = arith.constant 192 : i32
    %45 = tpu.dynamic_rotate %26 by %c192_i32 dim 1 : vector<8x256xf32>, i32 -> vector<8x256xf32>
    %46 = vector.broadcast %14 : vector<1x256xf32> to vector<8x256xf32>
    %47 = arith.mulf %45, %46 : vector<8x256xf32>
    %c188_i32 = arith.constant 188 : i32
    %48 = tpu.dynamic_rotate %26 by %c188_i32 dim 1 : vector<8x256xf32>, i32 -> vector<8x256xf32>
    %49 = vector.broadcast %15 : vector<1x256xf32> to vector<8x256xf32>
    %50 = arith.mulf %48, %49 : vector<8x256xf32>
    %51 = tpu.concatenate %29, %32, %35, %38, %26, %41, %44, %47, %50 in 0 : vector<8x256xf32>, vector<8x256xf32>, vector<8x256xf32>, vector<8x256xf32>, vector<8x256xf32>, vector<8x256xf32>, vector<8x256xf32>, vector<8x256xf32>, vector<8x256xf32> -> vector<72x256xf32>
    %cst_30 = arith.constant dense<0.000000e+00> : vector<8x256xf32>
    %52 = tpu.matmul %4, %51, %cst_30 {dimension_numbers = #tpu.dot_dimension_numbers<[1], [0], [0], [1], [0, 0, 1, 1], [], []>} : vector<8x72xf32>, vector<72x256xf32>, vector<8x256xf32> -> vector<8x256xf32>
    %53 = vector.broadcast %5 : vector<8x1xf32> to vector<8x256xf32>
    %54 = arith.addf %52, %53 : vector<8x256xf32>
    %c68_i32_31 = arith.constant 68 : i32
    %55 = tpu.dynamic_rotate %54 by %c68_i32_31 dim 1 : vector<8x256xf32>, i32 -> vector<8x256xf32>
    %56 = vector.broadcast %8 : vector<1x256xf32> to vector<8x256xf32>
    %57 = arith.mulf %55, %56 : vector<8x256xf32>
    %c64_i32_32 = arith.constant 64 : i32
    %58 = tpu.dynamic_rotate %54 by %c64_i32_32 dim 1 : vector<8x256xf32>, i32 -> vector<8x256xf32>
    %59 = vector.broadcast %9 : vector<1x256xf32> to vector<8x256xf32>
    %60 = arith.mulf %58, %59 : vector<8x256xf32>
    %c60_i32_33 = arith.constant 60 : i32
    %61 = tpu.dynamic_rotate %54 by %c60_i32_33 dim 1 : vector<8x256xf32>, i32 -> vector<8x256xf32>
    %62 = vector.broadcast %10 : vector<1x256xf32> to vector<8x256xf32>
    %63 = arith.mulf %61, %62 : vector<8x256xf32>
    %c4_i32_34 = arith.constant 4 : i32
    %64 = tpu.dynamic_rotate %54 by %c4_i32_34 dim 1 : vector<8x256xf32>, i32 -> vector<8x256xf32>
    %65 = vector.broadcast %11 : vector<1x256xf32> to vector<8x256xf32>
    %66 = arith.mulf %64, %65 : vector<8x256xf32>
    %c252_i32_35 = arith.constant 252 : i32
    %67 = tpu.dynamic_rotate %54 by %c252_i32_35 dim 1 : vector<8x256xf32>, i32 -> vector<8x256xf32>
    %68 = vector.broadcast %12 : vector<1x256xf32> to vector<8x256xf32>
    %69 = arith.mulf %67, %68 : vector<8x256xf32>
    %c196_i32_36 = arith.constant 196 : i32
    %70 = tpu.dynamic_rotate %54 by %c196_i32_36 dim 1 : vector<8x256xf32>, i32 -> vector<8x256xf32>
    %71 = vector.broadcast %13 : vector<1x256xf32> to vector<8x256xf32>
    %72 = arith.mulf %70, %71 : vector<8x256xf32>
    %c192_i32_37 = arith.constant 192 : i32
    %73 = tpu.dynamic_rotate %54 by %c192_i32_37 dim 1 : vector<8x256xf32>, i32 -> vector<8x256xf32>
    %74 = vector.broadcast %14 : vector<1x256xf32> to vector<8x256xf32>
    %75 = arith.mulf %73, %74 : vector<8x256xf32>
    %c188_i32_38 = arith.constant 188 : i32
    %76 = tpu.dynamic_rotate %54 by %c188_i32_38 dim 1 : vector<8x256xf32>, i32 -> vector<8x256xf32>
    %77 = vector.broadcast %15 : vector<1x256xf32> to vector<8x256xf32>
    %78 = arith.mulf %76, %77 : vector<8x256xf32>
    %79 = tpu.concatenate %57, %60, %63, %66, %54, %69, %72, %75, %78 in 0 : vector<8x256xf32>, vector<8x256xf32>, vector<8x256xf32>, vector<8x256xf32>, vector<8x256xf32>, vector<8x256xf32>, vector<8x256xf32>, vector<8x256xf32>, vector<8x256xf32> -> vector<72x256xf32>
    %cst_39 = arith.constant dense<0.000000e+00> : vector<1x256xf32>
    %80 = tpu.matmul %6, %79, %cst_39 {dimension_numbers = #tpu.dot_dimension_numbers<[1], [0], [0], [1], [0, 0, 1, 1], [], []>} : vector<1x72xf32>, vector<72x256xf32>, vector<1x256xf32> -> vector<1x256xf32>
    %81 = vector.broadcast %7 : vector<1x1xf32> to vector<1x256xf32>
    %82 = arith.addf %80, %81 : vector<1x256xf32>
    %83 = vector.broadcast %23 : vector<32x1xf32> to vector<32x256xf32>
    %84 = vector.broadcast %82 : vector<1x256xf32> to vector<32x256xf32>
    %85 = arith.addf %83, %84 : vector<32x256xf32>
    %86 = arith.negf %85 : vector<32x256xf32>
    %87 = math.exp %86 : vector<32x256xf32>
    %cst_40 = arith.constant 1.000000e+00 : f32
    %88 = vector.broadcast %cst_40 : f32 to vector<32x256xf32>
    %89 = arith.addf %88, %87 : vector<32x256xf32>
    %90 = arith.divf %88, %89 : vector<32x256xf32>
    %91 = arith.mulf %90, %17 : vector<32x256xf32>
    %92 = arith.addf %91, %17 : vector<32x256xf32>
    %c0_41 = arith.constant 0 : index
    %c0_42 = arith.constant 0 : index
    %c0_43 = arith.constant 0 : index
    %93 = vector.load %arg11[%c0_41, %c0_42, %c0_43] : memref<1x32x256xf32, #tpu.memory_space<vmem>>, vector<1x32x256xf32>
    %94 = vector.shape_cast %93 : vector<1x32x256xf32> to vector<32x256xf32>
    %95 = vector.shape_cast %92 : vector<32x256xf32> to vector<1x32x256xf32>
    tpu.vector_store %arg11[%c0_41, %c0_42, %c0_43], %95 {strides = array<i32>} : memref<1x32x256xf32, #tpu.memory_space<vmem>>, vector<1x32x256xf32>,
    return
  }
  func.func @transform_0(%arg0: i32) -> (i32, i32, i32) {
    %c0_i32 = arith.constant 0 : i32
    %c0_i32_0 = arith.constant 0 : i32
    %c0_i32_1 = arith.constant 0 : i32
    return %arg0, %c0_i32, %c0_i32_0 : i32, i32, i32
  }
  func.func @transform_1(%arg0: i32) -> (i32, i32) {
    %c0_i32 = arith.constant 0 : i32
    %c0_i32_0 = arith.constant 0 : i32
    %c0_i32_1 = arith.constant 0 : i32
    return %c0_i32, %c0_i32_0 : i32, i32
  }
  func.func @transform_2(%arg0: i32) -> (i32, i32) {
    %c0_i32 = arith.constant 0 : i32
    %c0_i32_0 = arith.constant 0 : i32
    %c0_i32_1 = arith.constant 0 : i32
    return %c0_i32, %c0_i32_0 : i32, i32
  }
  func.func @transform_3(%arg0: i32) -> (i32, i32) {
    %c0_i32 = arith.constant 0 : i32
    %c0_i32_0 = arith.constant 0 : i32
    %c0_i32_1 = arith.constant 0 : i32
    return %c0_i32, %c0_i32_0 : i32, i32
  }
  func.func @transform_4(%arg0: i32) -> (i32, i32) {
    %c0_i32 = arith.constant 0 : i32
    %c0_i32_0 = arith.constant 0 : i32
    %c0_i32_1 = arith.constant 0 : i32
    return %c0_i32, %c0_i32_0 : i32, i32
  }
  func.func @transform_5(%arg0: i32) -> (i32, i32) {
    %c0_i32 = arith.constant 0 : i32
    %c0_i32_0 = arith.constant 0 : i32
    %c0_i32_1 = arith.constant 0 : i32
    return %c0_i32, %c0_i32_0 : i32, i32
  }
  func.func @transform_6(%arg0: i32) -> (i32, i32) {
    %c0_i32 = arith.constant 0 : i32
    %c0_i32_0 = arith.constant 0 : i32
    %c0_i32_1 = arith.constant 0 : i32
    return %c0_i32, %c0_i32_0 : i32, i32
  }
  func.func @transform_7(%arg0: i32) -> (i32, i32) {
    %c0_i32 = arith.constant 0 : i32
    %c0_i32_0 = arith.constant 0 : i32
    %c0_i32_1 = arith.constant 0 : i32
    return %c0_i32, %c0_i32_0 : i32, i32
  }
  func.func @transform_8(%arg0: i32) -> (i32, i32) {
    %c0_i32 = arith.constant 0 : i32
    %c0_i32_0 = arith.constant 0 : i32
    %c0_i32_1 = arith.constant 0 : i32
    return %c0_i32, %c0_i32_0 : i32, i32
  }
  func.func @transform_9(%arg0: i32) -> (i32, i32) {
    %c0_i32 = arith.constant 0 : i32
    %c0_i32_0 = arith.constant 0 : i32
    %c0_i32_1 = arith.constant 0 : i32
    return %c0_i32, %c0_i32_0 : i32, i32
  }
  func.func @transform_10(%arg0: i32) -> (i32, i32, i32) {
    %c0_i32 = arith.constant 0 : i32
    %c0_i32_0 = arith.constant 0 : i32
    %c0_i32_1 = arith.constant 0 : i32
    return %arg0, %c0_i32, %c0_i32_0 : i32, i32, i32
  }
}

</mosaic_0001>

<bundles_post_ra>
// kernel: tpu_custom_call.1
= control target key start
LH: loop header
LB: loop body
LE: loop exit
PB: predicated region body
PF: predicated region fallthrough
CT: control target
= control target key end

     0   :  { %s1999_s0 = inlined_call_operand.hbm [shape: f32[2,32,256], index: 0, kind: input, shape index: {}]   ;;  %s2000_s1 = inlined_call_operand.vmem [shape: f32[9,256], index: 1, kind: input, shape index: {}]   ;;  %s2001_s2 = inlined_call_operand.hbm [shape: f32[32,32], index: 2, kind: input, shape index: {}]   ;;  %s2002_s3 = inlined_call_operand.vmem [shape: f32[32,1], index: 3, kind: input, shape index: {}]   ;;  %s2003_s4 = inlined_call_operand.vmem [shape: f32[8,32], index: 4, kind: input, shape index: {}]   ;;  %s2004_s5 = inlined_call_operand.vmem [shape: f32[8,1], index: 5, kind: input, shape index: {}]   ;;  %s2005_s6 = inlined_call_operand.vmem [shape: f32[8,72], index: 6, kind: input, shape index: {}]   ;;  %s2006_s7 = inlined_call_operand.vmem [shape: f32[8,1], index: 7, kind: input, shape index: {}]   ;;  %s2007_s8 = inlined_call_operand.vmem [shape: f32[1,72], index: 8, kind: input, shape index: {}]   ;;  %s2008_s9 = inlined_call_operand.<no memory space> [shape: f32[1,1], index: 9, kind: input, shape index: {}]   ;;  %s2009_s10 = inlined_call_operand.hbm [shape: f32[2,32,256], index: 10, kind: output, shape index: {}]  }
   0x1   :  { %2011 = sst [smem:[#allocation14_spill]] %s2001_s2  ;;  %v15_v0 = vstv %s2008_s9 }
   0x2   :  { %16 = vst [vmem:[#allocation2] sm:$0x1] %v15_v0 }
   0x3   :  { %17 = vsyncpa [#allocation4], 0 }
   0x4   :  { %19 = vsyncpa [#allocation4 + $0x1], 0 }
   0x5   :  { %20 = vsyncpa [#allocation7], 0 }
   0x6   :  { %21 = vsyncpa [#allocation5], 0 }
   0x7   :  { %23 = vsyncpa [#allocation5 + $0x1], 0  ;;  %s1445_s15 = smov 0   ;;  %s1447_s16 = smov 0  }
   0x8   :  { %s1449_s17 = smov 0   ;;  %s1451_s18 = smov 0  }
   0x9 LB: > { %2012 = sst [smem:[#allocation12_spill]] %s1367_s17  ;;  %s1466_s9 = sadd.s32 4294967295, %s1371_s18   ;;  %s1371_s18 = sphi %s1451_s18, %s2035_s18   ;;  %s1367_s17 = sphi %s1449_s17, %s2032_s17   ;;  %s1363_s16 = sphi %s1447_s16, %s2034_s16   ;;  %s1359_s15 = sphi %s1445_s15, %s2033_s15  }
   0xa   : > { %s1091_s19 = sadd.s32 4294967294, %s1371_s18   ;;  %p49_p0 = scmp.ne.s32.totalorder %s1363_s16, %s1359_s15 }
   0xb   : > { %p50_p1 = scmp.eq.s32.totalorder %s1466_s9, 0  ;;  %p262_p2 = scmp.eq.s32.totalorder %s1466_s9, 1 }
   0xc   : > { %p268_p3 = scmp.eq.s32.totalorder %s1091_s19, 1  ;;  %p1092_p5 = scmp.ge.s32.totalorder %s1371_s18, 1 }
   0xd   : > { %p1475_p4 = por %p50_p1, %p49_p0  ;;  %p275_p7 = scmp.lt.s32.totalorder %s1371_s18, 3 }
   0xe   : > { %p1480_p6 = por %p268_p3, %p49_p0  ;;  %s2015_s2 = sld [smem:[#allocation14_spill]] }
   0xf   : > { %p1488_p8 = pnand %p1092_p5, %p275_p7  ;;  %s1373_s26 = smov [#allocation6]  }
  0x10   : > { %s291_s27 = sshll.u32 %s1373_s26, 4  ;;  %s1498_s28 = sadd.s32 1, %s1371_s18   ;;  %s292_s27 = int_to_ptr.vmem [resolvable:$true] %s291_s27 }
  0x11   : > { %p1142_p9 = pneg %p1488_p8  ;;  %s1374_s29 = smov 128  }
  0x12   : > { %s1375_s30 = smov 8   ;;  %s33_s11 = ssub.s32 %s1371_s18, %s1498_s28 }
  0x13   : > { %p1143_p10 = pnand %p1142_p9, %p50_p1  ;;  %s36_s12 = sadd.s32 1, %s1367_s17 }
  0x14   : > { %s289_s24 = sshll.u32 %s2015_s2, 4  ;;  %p34_p12 = scmp.eq.s32.totalorder %s33_s11, 0  ;;  %s290_s24 = int_to_ptr.hbm [resolvable:$true] %s289_s24 }
  0x15   : > { %1145 = dma.hbm_to_vmem [thread:$0]  (!%p1143_p10), %s290_s24, 512, %s292_s27, [#allocation7], %s1374_s29, %s1374_s29, %s1375_s30  }
  0x16   : > { %p43_p13 = scmp.ne.s32.totalorder %s1367_s17, %s1363_s16  ;;  %p44_p0 = scmp.eq.s32.totalorder %s1371_s18, 0 }
  0x17   : > { %p1155_p3 = scmp.lt.s32.totalorder %s1371_s18, 2  ;;  %s326_s19 = sand.u32 1, %s1367_s17  }
  0x18   : > { %s1508_s13 = scalar_select %p34_p12, %s1367_s17, %s36_s12  }
  0x19   : > { %p45_p5 = por %p44_p0, %p43_p13  ;;  %p1512_p7 = por %p262_p2, %p43_p13 }
  0x1a   : > { %2017 = sst [smem:[#allocation13_spill]] %s1508_s13  ;;  %s1132_s22 = sshll.u32 %s1371_s18, 6 }
  0x1b   : > { %s1095_s23 = sshll.u32 %s326_s19, 6  ;;  %s335_s27 = scalar_lea.hbm %s1999_s0, %s1132_s22 }
  0x1c   : > { %s336_s29 = sshll.u32 %s335_s27, 4  ;;  %s330_s30 = scalar_lea.vmem [#allocation3], %s1095_s23  ;;  %s337_s29 = int_to_ptr.hbm [resolvable:$true] %s336_s29 }
  0x1d   : > { %s338_s11 = sshll.u32 %s330_s30, 4  ;;  %p1523_p9 = pnand %p1155_p3, %p45_p5  ;;  %s339_s11 = int_to_ptr.vmem [resolvable:$true] %s338_s11 }
  0x1e   : > { %s327_s2 = scalar_lea.sflag [#allocation4], %s326_s19  ;;  %s1271_s13 = sshra.s32 %s337_s29, 4  ;;  %s1272_s13 = int_to_ptr.hbm [resolvable:$true] %s1271_s13 }
  0x1f   : > { %s1273_s17 = scalar_lea.hbm %s1272_s13, 64  ;;  %p1275_p10 = pneg %p1523_p9 }
  0x20   : > { %p1274_p2 = scmp.ne.s32.totalorder %s1272_s13, %s1273_s17  ;;  %s1278_s26 = scalar_lea.hbm %s1999_s0, 128 }
  0x21   : > { %p1279_p0 = scmp.lt.s32.totalorder %s1272_s13, %s1999_s0  ;;  %p1280_p3 = scmp.lt.s32.totalorder %s1278_s26, %s1273_s17 }
  0x22   : > { %p1276_p12 = pnand %p1275_p10, %p1274_p2 }
  0x23   : > { %p1281_p5 = por %p1280_p3, %p1279_p0 }
  0x24   : > { %p1277_p13 = pneg %p1276_p12 }
  0x26   : > { %p1282_p11 = pnand %p1281_p5, %p1277_p13 }
  0x28   : > { %1285 = shalt.err (!%p1282_p11)
}
  0x29   : > { %s1376_s19 = smov 256   ;;  %s1377_s30 = smov 16  }
  0x2a   : > { %1149 = dma.hbm_to_vmem [thread:$0]  (!%p1523_p9), %s337_s29, 1024, %s339_s11, %s327_s2, %s1376_s19, %s1376_s19, %s1377_s30  }
  0x2b   : > { %350 = sbr.rel (%p1488_p8) target bundleno = 809 (0x329), region = 60  ;;  %s1540_s22 = sand.u32 (!%p1488_p8), 1, %s1363_s16  }
  0x2c   : > { %s1099_s13 = sshll.u32 (!%p1488_p8), %s1540_s22, 6  ;;  %s353_s17 = scalar_lea.sflag (!%p1488_p8), [#allocation4], %s1540_s22 }
  0x2d   : > { %s356_s23 = scalar_lea.vmem (!%p1488_p8), [#allocation3], %s1099_s13 }
  0x30   : > { %1346 = dma.done.wait (%p1475_p4), %s353_s17, 1024  }
  0x31   : > { %1348 = vsyncadd (%p1475_p4), %s353_s17, 4294966272 }
  0x32   : > { %1350 = dma.done.wait (%p50_p1), [#allocation7], 512  }
  0x33   : > { %1352 = vsyncadd (%p50_p1), [#allocation7], 4294966784  ;;  %v1378_v1 = vmov 0   ;;  %v1554_v2 = vld [vmem:[%s356_s23 + $0x30] sm:$0xff]  ;;  %v1556_v3 = vld [vmem:[%s356_s23 + $0x38] sm:$0xff]  ;;  %vm459_vm0 = vcmask 261120   ;;  %v553_v22 = vlaneseq }
  0x34   : > { %1204 = vset.pattern.permute.xlu0 %v1378_v1  ;;  %1205 = vset.pattern.permute.xlu2 %v1378_v1  ;;  %v1558_v4 = vld [vmem:[%s356_s23 + $0x20] sm:$0xff]  ;;  %v1562_v5 = vld [vmem:[%s356_s23 + $0x28] sm:$0xff]  ;;  %v1564_v6 = vld [vmem:[%s356_s23 + $0x10] sm:$0xff]  ;;  %s1379_s11 = smov 68   ;;  %s1380_s12 = smov 64   ;;  %v445_v17 = vadd.f32 %v1556_v3, %v1554_v2  ;;  %vm647_vm6 = vcmask 588800  }
  0x35   : > { %1206 = vset.pattern.permute.xlu1 %v1378_v1  ;;  %521 = vmatpush.msra.mxu1 %v1554_v2  ;;  %v1566_v7 = vld [vmem:[%s356_s23 + $0x18] sm:$0xff]  ;;  %v1573_v9 = vld [vmem:[%s356_s23] sm:$0xff]  ;;  %v1575_v10 = vld [vmem:[%s356_s23 + $0x8] sm:$0xff]  ;;  %s1381_s26 = smov 60   ;;  %s1382_s24 = smov 124   ;;  %v442_v18 = vadd.f32 %v1562_v5, %v1558_v4  ;;  %v1618_v25 = vand.u32 127, %v553_v22 }
  0x36   : > { %541 = vmatpush.msra.mxu2 %v1556_v3  ;;  %v408_v8 = vld [vmem:[%s2004_s5] sm:$0xff]  ;;  %s1383_s27 = smov 4   ;;  %v439_v19 = vadd.f32 %v1566_v7, %v1564_v6  ;;  %v436_v20 = vadd.f32 %v1575_v10, %v1573_v9  ;;  %v1623_v26 = vld [vmem:[%s2000_s1 + $0x10] ss:$8 sm:$0x3]  ;;  %s1925_s30 = scalar_lea.vmem [#allocation8], %s1099_s13 }
  0x37   : > { %522 = vmatpush.msra.mxu1 %v1558_v4  ;;  %503 = vperm.xlu0 %1204, %v408_v8   ;;  %v407_v11 = vld [vmem:[%s2003_s4] sm:$0xff]  ;;  %vm569_vm1 = vcmp.lt.s32.totalorder %v1618_v25, 64  ;;  %vm583_vm2 = vcmp.lt.s32.totalorder %v1618_v25, 60  ;;  %v636_v29 = vperm.slane %v1623_v26, 0  ;;  %v637_v30 = vperm.slane %v1623_v26, 1  ;;  %s1133_s13 = sshll.u32 %s1466_s9, 6 }
  0x38   : > { %542 = vmatpush.msra.mxu2 %v1562_v5  ;;  %v1628_v27 = vld [vmem:[%s2000_s1 + $0x7] ss:$8 sm:$0x3]  ;;  %v1637_v31 = vld [vmem:[%s2000_s1 + $0x6] ss:$8 sm:$0x3]  ;;  %s1004_s2 = scalar_lea.hbm %s2009_s10, %s1133_s13 }
  0x39   : > { %523 = vmatpush.msra.mxu1 %v1564_v6  ;;  %vm555_vm3 = vcmp.lt.s32.totalorder %v1618_v25, 68  ;;  %v629_v33 = vperm.slane %v1628_v27, 0  ;;  %v630_v34 = vperm.slane %v1628_v27, 1  ;;  %v622_v42 = vperm.slane %v1637_v31, 0  ;;  %s1005_s9 = sshll.u32 %s1925_s30, 4  ;;  %s1007_s20 = sshll.u32 %s1004_s2, 4  ;;  %s1006_s9 = int_to_ptr.vmem [resolvable:$true] %s1005_s9  ;;  %s1008_s20 = int_to_ptr.hbm [resolvable:$true] %s1007_s20 }
  0x3a   : > { %543 = vmatpush.msra.mxu2 %v1566_v7  ;;  %v623_v43 = vperm.slane %v1637_v31, 1  ;;  %v1663_v46 = vld [vmem:[%s2000_s1 + $0x5] ss:$8 sm:$0x3]  ;;  %vm611_vm4 = vcmp.lt.s32.totalorder %v1618_v25, 124  ;;  %vm597_vm5 = vcmp.lt.s32.totalorder %v1618_v25, 4 }
  0x3b   : > { %524 = vmatpush.msra.mxu1 %v1573_v9  ;;  %v615_v51 = vperm.slane %v1663_v46, 0  ;;  %v616_v52 = vperm.slane %v1663_v46, 1  ;;  %v1687_v59 = vld [vmem:[%s2000_s1 + $0x3] ss:$8 sm:$0x3]  ;;  %s1321_s25 = scalar_lea.hbm %s2009_s10, 128 }
  0x3c   : > { %544 = vmatpush.msra.mxu2 %v1575_v10  ;;  %1113 = vmatmul.msk.f32.vlgmr.msra.gmra.mxu1 %vm459_vm0, %v407_v11  ;;  %v1692_v60 = vld [vmem:[%s2000_s1 + $0x2] ss:$8 sm:$0x3]  ;;  %v601_v61 = vperm.slane %v1687_v59, 0  ;;  %v602_v62 = vperm.slane %v1687_v59, 1 }
  0x3d   : > { %1114 = vmatmul.msk.f32.vlgmr.msra.gmra.mxu2 %vm459_vm0, %v407_v11  ;;  %v1702_v63 = vld [vmem:[%s2000_s1 + $0x1] ss:$8 sm:$0x3]  ;;  %v587_v8 = vperm.slane %v1692_v60, 0  ;;  %v588_v11 = vperm.slane %v1692_v60, 1 }
  0x3e   : > { %v411_v60 = vld [vmem:[%s2007_s8] sm:$0x1] }
  0xa9   : > { %v504_v12 = vpop.permute.xlu0 %503 }
  0xb9   : > { %v526_v13 = vpop.f32.mrf.mxu1 }
  0xba   : > { %v1586_v14 = vadd.f32 %v526_v13, %v504_v12 }
  0xbc   : > { %549 = vrot.lane.b32.xlu2 %v1586_v14, %s1379_s11  ;;  %565 = vrot.lane.b32.xlu1 %v1586_v14, %s1380_s12 }
  0xbd   : > { %579 = vrot.lane.b32.xlu0 %v1586_v14, %s1381_s26 }
  0xc0   : > { %v546_v15 = vpop.f32.mrf.mxu2 }
  0xc1   : > { %v1594_v16 = vadd.f32 %v546_v15, %v504_v12  ;;  %v1709_v12 = vld [vmem:[%s2000_s1] ss:$8 sm:$0x3] }
  0xc2   : > { %v560_v22 = vperm.slane %v1709_v12, 1 }
  0xc4   : > { %567 = vrot.lane.b32.xlu2 %v1594_v16, %s1380_s12  ;;  %581 = vrot.lane.b32.xlu1 %v1594_v16, %s1381_s26 }
  0xc5   : > { %551 = vrot.lane.b32.xlu0 %v1594_v16, %s1379_s11 }
  0xcc   : > { %609 = vrot.lane.b32.xlu2 %v1594_v16, %s1382_s24  ;;  %607 = vrot.lane.b32.xlu1 %v1586_v14, %s1382_s24 }
  0xcd   : > { %593 = vrot.lane.b32.xlu0 %v1586_v14, %s1383_s27 }
  0xd4   : > { %595 = vrot.lane.b32.xlu1 %v1594_v16, %s1383_s27 }
  0xf5   : > { %446 = vadd.xlane.f32.xlu2 %v445_v17  ;;  %v573_v17 = vperm.slane %v1702_v63, 0 }
  0xf7   : > { %443 = vadd.xlane.f32.xlu0 %v442_v18  ;;  %v574_v18 = vperm.slane %v1702_v63, 1 }
  0xfe   : > { %440 = vadd.xlane.f32.xlu1 %v439_v19  ;;  %v559_v19 = vperm.slane %v1709_v12, 0 }
  0xff   : > { %437 = vadd.xlane.f32.xlu0 %v436_v20 }
 0x116   : > { %v550_v21 = vpop.permute.xlu2 %549 }
 0x11e   : > { %v568_v28 = vpop.permute.xlu2 %567 }
 0x126   : > { %v610_v53 = vpop.permute.xlu2 %609 }
 0x12e   : > { %v566_v23 = vpop.permute.xlu1 %565 }
 0x12f   : > { %v580_v24 = vpop.permute.xlu0 %579  ;;  %v570_v35 = vsel %vm569_vm1, %v566_v23, %v568_v28  ;;  %v571_v36 = vsel %vm569_vm1, %v568_v28, %v566_v23  ;;  %v1384_v28 = vmov 256.0  }
 0x130   : > { %v633_v47 = vmul.f32 %v629_v33, %v570_v35  ;;  %v634_v48 = vmul.f32 %v630_v34, %v571_v36  ;;  %v577_v23 = vmul.f32 %v573_v17, %v571_v36  ;;  %1207 = vrcp.f32 %v1384_v28  ;;  %v410_v36 = vld [vmem:[%s2006_s7] sm:$0xff]  ;;  %v404_v28 = vld [vmem:[%s2002_s3 + $0x8] sm:$0xff] }
 0x131   : > { %644 = vperm.xlu2 %1205, %v410_v36  }
 0x136   : > { %v582_v32 = vpop.permute.xlu1 %581 }
 0x137   : > { %v585_v37 = vsel %vm583_vm2, %v582_v32, %v580_v24  ;;  %v552_v38 = vpop.permute.xlu0 %551  ;;  %v584_v39 = vsel %vm583_vm2, %v580_v24, %v582_v32  ;;  %v578_v24 = vmul.f32 %v574_v18, %v570_v35  ;;  %v1208_v35 = vpop.eup %1207 }
 0x138   : > { %v640_v40 = vmul.f32 %v636_v29, %v584_v39  ;;  %v641_v41 = vmul.f32 %v637_v30, %v585_v37  ;;  %v556_v44 = vsel %vm555_vm3, %v550_v21, %v552_v38  ;;  %v557_v45 = vsel %vm555_vm3, %v552_v38, %v550_v21  ;;  %v409_v38 = vld [vmem:[%s2005_s6] sm:$0xff] }
 0x139   : > { %v626_v49 = vmul.f32 %v622_v42, %v556_v44  ;;  %v627_v50 = vmul.f32 %v623_v43, %v557_v45  ;;  %v591_v20 = vmul.f32 %v587_v8, %v585_v37  ;;  %v592_v21 = vmul.f32 %v588_v11, %v584_v39 }
 0x13a   : > { %658 = vmatpush.msra.mxu3 %v640_v40  ;;  %678 = vmatpush.msrb.mxu1 %v641_v41  ;;  %v563_v32 = vmul.f32 %v559_v19, %v557_v45  ;;  %v564_v37 = vmul.f32 %v560_v22, %v556_v44  ;;  %v449_v39 = vmul.f32 256.0, %v1208_v35  ;;  %vm453_vm7 = vweird.f32 %v1208_v35 }
 0x13c   : > { %659 = vmatpush.msra.mxu3 %v633_v47  ;;  %679 = vmatpush.msrb.mxu1 %v634_v48  ;;  %v450_v40 = vsub.f32 1.0, %v449_v39 }
 0x13e   : > { %v608_v54 = vpop.permute.xlu1 %607  ;;  %660 = vmatpush.msra.mxu3 %v626_v49  ;;  %680 = vmatpush.msrb.mxu1 %v627_v50  ;;  %v451_v41 = vmul.f32 %v1208_v35, %v450_v40 }
 0x13f   : > { %v612_v55 = vsel %vm611_vm4, %v608_v54, %v610_v53  ;;  %v613_v56 = vsel %vm611_vm4, %v610_v53, %v608_v54  ;;  %v594_v0 = vpop.permute.xlu0 %593 }
 0x140   : > { %v619_v57 = vmul.f32 %v615_v51, %v612_v55  ;;  %v620_v58 = vmul.f32 %v616_v52, %v613_v56  ;;  %v452_v44 = vadd.f32 %v1208_v35, %v451_v41 }
 0x142   : > { %661 = vmatpush.msra.mxu3 %v619_v57  ;;  %681 = vmatpush.msrb.mxu1 %v620_v58  ;;  %v454_v45 = vsel %vm453_vm7, %v1208_v35, %v452_v44  ;;  %v399_v57 = vld [vmem:[#allocation6] sm:$0xff]  ;;  %v400_v58 = vld [vmem:[#allocation6 + $0x8] sm:$0xff]  ;;  %v406_v35 = vld [vmem:[%s2002_s3 + $0x18] sm:$0xff] }
 0x144   : > { %662 = vmatpush.msra.mxu3 %v1586_v14  ;;  %682 = vmatpush.msrb.mxu1 %v1594_v16 }
 0x146   : > { %v596_v1 = vpop.permute.xlu1 %595 }
 0x147   : > { %v598_v13 = vsel %vm597_vm5, %v594_v0, %v596_v1  ;;  %v599_v14 = vsel %vm597_vm5, %v596_v1, %v594_v0  ;;  %v401_v0 = vld [vmem:[#allocation6 + $0x10] sm:$0xff]  ;;  %v402_v1 = vld [vmem:[#allocation6 + $0x18] sm:$0xff] }
 0x148   : > { %v605_v15 = vmul.f32 %v601_v61, %v599_v14  ;;  %v606_v16 = vmul.f32 %v602_v62, %v598_v13 }
 0x14a   : > { %663 = vmatpush.msra.mxu3 %v605_v15  ;;  %683 = vmatpush.msrb.mxu1 %v606_v16 }
 0x14c   : > { %664 = vmatpush.msra.mxu3 %v591_v20  ;;  %684 = vmatpush.msrb.mxu1 %v592_v21  ;;  %v403_v21 = vld [vmem:[%s2002_s3] sm:$0xff] }
 0x14e   : > { %665 = vmatpush.msra.mxu3 %v577_v23  ;;  %685 = vmatpush.msrb.mxu1 %v578_v24 }
 0x150   : > { %666 = vmatpush.msra.mxu3 %v563_v32  ;;  %686 = vmatpush.msrb.mxu1 %v564_v37 }
 0x151   : > { %1115 = vmatmul.msk.f32.vlgmr.msra.gmra.mxu3 %vm647_vm6, %v409_v38  ;;  %1116 = vmatmul.msk.f32.vlgmr.msrb.gmra.mxu1 %vm647_vm6, %v409_v38 }
 0x168   : > { %v447_v47 = vpop.xlane.xlu2 %446 }
 0x169   : > { %v458_v48 = vmul.f32 %v454_v45, %v447_v47  ;;  %v412_v47 = vld [vmem:[#allocation2] sm:$0x1] }
 0x16a   : > { %v444_v49 = vpop.xlane.xlu0 %443 }
 0x16b   : > { %v457_v50 = vmul.f32 %v454_v45, %v444_v49  ;;  %484 = vmatpush.msra.mxu0 %v458_v48 }
 0x16d   : > { %485 = vmatpush.msra.mxu0 %v457_v50 }
 0x171   : > { %v441_v53 = vpop.xlane.xlu1 %440 }
 0x172   : > { %v456_v54 = vmul.f32 %v454_v45, %v441_v53  ;;  %v438_v55 = vpop.xlane.xlu0 %437 }
 0x173   : > { %v455_v56 = vmul.f32 %v454_v45, %v438_v55 }
 0x174   : > { %486 = vmatpush.msra.mxu0 %v456_v54  ;;  %v405_v54 = vld [vmem:[%s2002_s3 + $0x10] sm:$0xff] }
 0x176   : > { %487 = vmatpush.msra.mxu0 %v455_v56 }
 0x177   : > { %1109 = vmatmul.msk.f32.vlgmr.msra.gmra.mxu0 %vm459_vm0, %v399_v57 }
 0x17f   : > { %1110 = vmatmul.msk.f32.gmra.mxu0 %vm459_vm0, %v400_v58 }
 0x187   : > { %1111 = vmatmul.msk.f32.gmra.mxu0 %vm459_vm0, %v401_v0 }
 0x18b   : > { %v645_v13 = vpop.permute.xlu2 %644 }
 0x18f   : > { %1112 = vmatmul.msk.f32.gmra.mxu0 %vm459_vm0, %v402_v1 }
 0x1ce   : > { %v688_v14 = vpop.f32.mrf.mxu1 }
 0x1cf   : > { %v1747_v15 = vadd.f32 %v688_v14, %v645_v13 }
 0x1d1   : > { %701 = vrot.lane.b32.xlu2 %v1747_v15, %s1380_s12  ;;  %709 = vrot.lane.b32.xlu0 %v1747_v15, %s1381_s26 }
 0x1d4   : > { %v668_v16 = vpop.f32.mrf.mxu3 }
 0x1d5   : > { %v669_v20 = vadd.f32 %v668_v16, %v645_v13 }
 0x1d7   : > { %707 = vrot.lane.b32.xlu1 %v669_v20, %s1381_s26  ;;  %s1315_s26 = sshra.s32 %s1008_s20, 4  ;;  %s1316_s26 = int_to_ptr.hbm [resolvable:$true] %s1315_s26 }
 0x1d8   : > { %p1322_p11 = scmp.lt.s32.totalorder %s1316_s26, %s2009_s10 }
 0x1d9   : > { %699 = vrot.lane.b32.xlu2 %v669_v20, %s1380_s12  ;;  %693 = vrot.lane.b32.xlu0 %v1747_v15, %s1379_s11  ;;  %s993_s12 = scalar_lea.sflag [#allocation5], %s1540_s22 }
 0x1df   : > { %691 = vrot.lane.b32.xlu1 %v669_v20, %s1379_s11  ;;  %s1317_s11 = scalar_lea.hbm %s1316_s26, 64 }
 0x1e0   : > { %p1318_p1 = scmp.ne.s32.totalorder %s1316_s26, %s1317_s11  ;;  %p1323_p9 = scmp.lt.s32.totalorder %s1321_s25, %s1317_s11 }
 0x1e1   : > { %723 = vrot.lane.b32.xlu2 %v669_v20, %s1382_s24  ;;  %715 = vrot.lane.b32.xlu0 %v669_v20, %s1383_s27 }
 0x1e2   : > { %p1319_p4 = pnand %p1318_p1, %p1512_p7  ;;  %p1324_p2 = por %p1323_p9, %p1322_p11 }
 0x1e4   : > { %p1320_p8 = pneg %p1319_p4 }
 0x1e6   : > { %p1325_p10 = pnand %p1324_p2, %p1320_p8 }
 0x1e7   : > { %725 = vrot.lane.b32.xlu1 %v1747_v15, %s1382_s24 }
 0x1e9   : > { %717 = vrot.lane.b32.xlu2 %v1747_v15, %s1383_s27 }
 0x1ef   : > { %739 = vperm.xlu1 %1206, %v412_v47  }
 0x1f4   : > { %v489_v23 = vpop.f32.mrf.mxu0 }
 0x1f5   : > { %v490_v24 = vadd.f32 %v489_v23, %v403_v21 }
 0x1f7   : > { %788 = vperm.xlu0 %1204, %v490_v24  }
 0x1fc   : > { %v492_v32 = vpop.f32.mrf.mxu0 }
 0x1fd   : > { %v493_v37 = vadd.f32 %v492_v32, %v404_v28 }
 0x1ff   : > { %793 = vperm.xlu2 %1205, %v493_v37  }
 0x204   : > { %v495_v38 = vpop.f32.mrf.mxu0 }
 0x205   : > { %v496_v0 = vadd.f32 %v495_v38, %v405_v54 }
 0x207   : > { %798 = vperm.xlu1 %1206, %v496_v0  }
 0x20c   : > { %v498_v36 = vpop.f32.mrf.mxu0 }
 0x20d   : > { %v499_v39 = vadd.f32 %v498_v36, %v406_v35 }
 0x20f   : > { %803 = vperm.xlu0 %1204, %v499_v39  }
 0x22b   : > { %v702_v40 = vpop.permute.xlu2 %701 }
 0x233   : > { %v700_v44 = vpop.permute.xlu2 %699 }
 0x234   : > { %v703_v48 = vsel %vm569_vm1, %v700_v44, %v702_v40  ;;  %v704_v49 = vsel %vm569_vm1, %v702_v40, %v700_v44 }
 0x235   : > { %v733_v57 = vmul.f32 %v703_v48, %v629_v33  ;;  %v734_v58 = vmul.f32 %v704_v49, %v630_v34 }
 0x23b   : > { %v724_v13 = vpop.permute.xlu2 %723 }
 0x243   : > { %v710_v41 = vpop.permute.xlu0 %709  ;;  %v718_v23 = vpop.permute.xlu2 %717 }
 0x249   : > { %v708_v45 = vpop.permute.xlu1 %707 }
 0x24a   : > { %v711_v50 = vsel %vm583_vm2, %v708_v45, %v710_v41  ;;  %v712_v53 = vsel %vm583_vm2, %v710_v41, %v708_v45 }
 0x24b   : > { %v735_v55 = vmul.f32 %v711_v50, %v636_v29  ;;  %v736_v56 = vmul.f32 %v712_v53, %v637_v30  ;;  %v694_v1 = vpop.permute.xlu0 %693  ;;  %v713_v46 = vmul.f32 %v712_v53, %v587_v8  ;;  %v714_v25 = vmul.f32 %v711_v50, %v588_v11 }
 0x24d   : > { %753 = vmatpush.msrb.mxu2 %v735_v55  ;;  %773 = vmatpush.msrb.mxu3 %v736_v56 }
 0x24f   : > { %754 = vmatpush.msrb.mxu2 %v733_v57  ;;  %774 = vmatpush.msrb.mxu3 %v734_v58 }
 0x251   : > { %v692_v14 = vpop.permute.xlu1 %691 }
 0x252   : > { %v695_v29 = vsel %vm555_vm3, %v692_v14, %v694_v1  ;;  %v696_v26 = vsel %vm555_vm3, %v694_v1, %v692_v14 }
 0x253   : > { %v731_v30 = vmul.f32 %v695_v29, %v622_v42  ;;  %v732_v27 = vmul.f32 %v696_v26, %v623_v43  ;;  %v716_v33 = vpop.permute.xlu0 %715  ;;  %v697_v59 = vmul.f32 %v696_v26, %v559_v19 }
 0x254   : > { %v719_v31 = vsel %vm597_vm5, %v716_v33, %v718_v23  ;;  %v720_v43 = vsel %vm597_vm5, %v718_v23, %v716_v33 }
 0x255   : > { %755 = vmatpush.msrb.mxu2 %v731_v30  ;;  %775 = vmatpush.msrb.mxu3 %v732_v27  ;;  %v721_v28 = vmul.f32 %v720_v43, %v601_v61  ;;  %v698_v61 = vmul.f32 %v695_v29, %v560_v22 }
 0x259   : > { %v726_v34 = vpop.permute.xlu1 %725 }
 0x25a   : > { %v727_v16 = vsel %vm611_vm4, %v724_v13, %v726_v34  ;;  %v728_v21 = vsel %vm611_vm4, %v726_v34, %v724_v13 }
 0x25b   : > { %v729_v24 = vmul.f32 %v727_v16, %v615_v51  ;;  %v730_v42 = vmul.f32 %v728_v21, %v616_v52  ;;  %v722_v51 = vmul.f32 %v719_v31, %v602_v62  ;;  %v705_v52 = vmul.f32 %v704_v49, %v573_v17 }
 0x25d   : > { %756 = vmatpush.msrb.mxu2 %v729_v24  ;;  %776 = vmatpush.msrb.mxu3 %v730_v42 }
 0x25f   : > { %757 = vmatpush.msrb.mxu2 %v669_v20  ;;  %777 = vmatpush.msrb.mxu3 %v1747_v15  ;;  %v706_v15 = vmul.f32 %v703_v48, %v574_v18  ;;  %v794_v20 = vpop.permute.xlu2 %793 }
 0x261   : > { %758 = vmatpush.msrb.mxu2 %v721_v28  ;;  %778 = vmatpush.msrb.mxu3 %v722_v51  ;;  %v740_v62 = vpop.permute.xlu1 %739 }
 0x262   : > { %v742_v8 = vperm.slane %v740_v62, 0 }
 0x263   : > { %759 = vmatpush.msrb.mxu2 %v713_v46  ;;  %779 = vmatpush.msrb.mxu3 %v714_v25 }
 0x265   : > { %760 = vmatpush.msrb.mxu2 %v705_v52  ;;  %780 = vmatpush.msrb.mxu3 %v706_v15 }
 0x267   : > { %761 = vmatpush.msrb.mxu2 %v697_v59  ;;  %781 = vmatpush.msrb.mxu3 %v698_v61 }
 0x268   : > { %1117 = vmatmul.msk.f32.vlgmr.msrb.gmra.mxu2 %vm647_vm6, %v411_v60  ;;  %1118 = vmatmul.msk.f32.vlgmr.msrb.gmra.mxu3 %vm647_vm6, %v411_v60 }
 0x269   : > { %v789_v63 = vpop.permute.xlu0 %788 }
 0x279   : > { %v799_v37 = vpop.permute.xlu1 %798 }
 0x281   : > { %v804_v32 = vpop.permute.xlu0 %803 }
 0x2eb   : > { %v763_v11 = vpop.f32.mrf.mxu2  ;;  %v783_v17 = vpop.f32.mrf.mxu3 }
 0x2ec   : > { %v764_v18 = vadd.f32 %v763_v11, %v742_v8  ;;  %v784_v19 = vadd.f32 %v783_v17, %v742_v8 }
 0x2ee   : > { %v806_v12 = vperm.slane %v764_v18, 0  ;;  %v807_v22 = vperm.slane %v784_v19, 0 }
 0x2f0   : > { %v808_v38 = vadd.f32 %v806_v12, %v789_v63  ;;  %v810_v35 = vadd.f32 %v806_v12, %v794_v20  ;;  %v812_v36 = vadd.f32 %v806_v12, %v799_v37  ;;  %v814_v39 = vadd.f32 %v806_v12, %v804_v32 }
 0x2f1   : > { %v809_v40 = vadd.f32 %v807_v22, %v789_v63  ;;  %v811_v47 = vadd.f32 %v807_v22, %v794_v20  ;;  %v813_v49 = vadd.f32 %v807_v22, %v799_v37  ;;  %v815_v50 = vadd.f32 %v807_v22, %v804_v32 }
 0x2f2   : > { %v1119_v41 = vmul.f32 -1.442695, %v808_v38  ;;  %v1121_v44 = vmul.f32 -1.442695, %v810_v35  ;;  %v1123_v45 = vmul.f32 -1.442695, %v812_v36 }
 0x2f3   : > { %v1125_v48 = vmul.f32 -1.442695, %v814_v39  ;;  %v1120_v53 = vmul.f32 -1.442695, %v809_v40  ;;  %v1122_v54 = vmul.f32 -1.442695, %v811_v47 }
 0x2f4   : > { %1209 = vpow2.f32 %v1119_v41  ;;  %v1124_v55 = vmul.f32 -1.442695, %v813_v49  ;;  %v1126_v56 = vmul.f32 -1.442695, %v815_v50 }
 0x2f5   : > { %1211 = vpow2.f32 %v1121_v44 }
 0x2f6   : > { %1213 = vpow2.f32 %v1123_v45 }
 0x2f7   : > { %1215 = vpow2.f32 %v1125_v48 }
 0x2f8   : > { %1217 = vpow2.f32 %v1120_v53 }
 0x2f9   : > { %1219 = vpow2.f32 %v1122_v54 }
 0x2fa   : > { %v1210_v57 = vpop.eup %1209  ;;  %1221 = vpow2.f32 %v1124_v55 }
 0x2fb   : > { %v1212_v58 = vpop.eup %1211  ;;  %v1834_v0 = vadd.f32 1.0, %v1210_v57  ;;  %1223 = vpow2.f32 %v1126_v56 }
 0x2fc   : > { %v1214_v1 = vpop.eup %1213  ;;  %v1836_v13 = vadd.f32 1.0, %v1212_v58 }
 0x2fd   : > { %v1216_v14 = vpop.eup %1215  ;;  %v1838_v29 = vadd.f32 1.0, %v1214_v1  ;;  %1225 = vrcp.f32 %v1834_v0  ;;  %v857_v33 = vand.u32 2147483647, %v1834_v0  ;;  %v859_v34 = vand.u32 2147483648, %v1834_v0 }
 0x2fe   : > { %v1841_v26 = vadd.f32 1.0, %v1216_v14  ;;  %1227 = vrcp.f32 %v1836_v13  ;;  %v1218_v30 = vpop.eup %1217  ;;  %v887_v21 = vand.u32 2147483647, %v1836_v13  ;;  %v889_v23 = vand.u32 2147483648, %v1836_v13 }
 0x2ff   : > { %1229 = vrcp.f32 %v1838_v29  ;;  %v1220_v27 = vpop.eup %1219  ;;  %v917_v42 = vand.u32 2147483647, %v1838_v29  ;;  %v919_v31 = vand.u32 2147483648, %v1838_v29  ;;  %vm853_vm8 = vweird.f32 %v1834_v0 }
 0x300   : > { %v1222_v16 = vpop.eup %1221  ;;  %1231 = vrcp.f32 %v1841_v26  ;;  %vm883_vm9 = vweird.f32 %v1836_v13  ;;  %v1854_v28 = vadd.f32 1.0, %v1218_v30  ;;  %v1856_v51 = vadd.f32 1.0, %v1220_v27 }
 0x301   : > { %v1224_v24 = vpop.eup %1223  ;;  %vm1859_vm10 = vcmp.eq.f32.partialorder %v857_v33, 8.507059e+37  ;;  %v860_v15 = vor.u32 1.1754944e-38, %v859_v34  ;;  %vm913_vm11 = vweird.f32 %v1838_v29  ;;  %v947_v59 = vand.u32 2147483647, %v1841_v26 }
 0x302   : > { %vm1866_vm12 = vcmp.eq.f32.partialorder %v887_v21, 8.507059e+37  ;;  %v890_v63 = vor.u32 1.1754944e-38, %v889_v23  ;;  %v949_v8 = vand.u32 2147483648, %v1841_v26  ;;  %1233 = vrcp.f32 %v1854_v28 }
 0x303   : > { %v1226_v43 = vpop.eup %1225  ;;  %vm1873_vm13 = vcmp.eq.f32.partialorder %v917_v42, 8.507059e+37  ;;  %v920_v19 = vor.u32 1.1754944e-38, %v919_v31  ;;  %vm943_vm14 = vweird.f32 %v1841_v26  ;;  %v1878_v20 = vadd.f32 1.0, %v1222_v16 }
 0x304   : > { %v1228_v46 = vpop.eup %1227  ;;  %v849_v25 = vmul.f32 %v1226_v43, %v1834_v0  ;;  %vm854_vm15 = vweird.f32 %v1226_v43  ;;  %v1880_v32 = vadd.f32 1.0, %v1224_v24  ;;  %1235 = vrcp.f32 %v1856_v51 }
 0x305   : > { %v1230_v61 = vpop.eup %1229  ;;  %v879_v60 = vmul.f32 %v1228_v46, %v1836_v13  ;;  %vm1884_vm0 = vcmp.eq.f32.partialorder %v947_v59, 8.507059e+37  ;;  %vm884_vm1 = vweird.f32 %v1228_v46  ;;  %v950_v40 = vor.u32 1.1754944e-38, %v949_v8  ;;  %vm855_vm3 = vmor %vm853_vm8, %vm854_vm15 }
 0x306   : > { %v850_v11 = vsub.f32 1.0, %v849_v25  ;;  %v909_v17 = vmul.f32 %v1230_v61, %v1838_v29  ;;  %v1232_v12 = vpop.eup %1231  ;;  %vm914_vm2 = vweird.f32 %v1230_v61  ;;  %v872_v47 = vand.u32 2147483647, %v1854_v28  ;;  %vm885_vm6 = vmor %vm883_vm9, %vm884_vm1 }
 0x307   : > { %v880_v22 = vsub.f32 1.0, %v879_v60  ;;  %v939_v35 = vmul.f32 %v1232_v12, %v1841_v26  ;;  %vm944_vm4 = vweird.f32 %v1232_v12  ;;  %vm868_vm5 = vweird.f32 %v1854_v28  ;;  %vm915_vm7 = vmor %vm913_vm11, %vm914_vm2 }
 0x308   : > { %v851_v37 = vmul.f32 %v1226_v43, %v850_v11  ;;  %v910_v38 = vsub.f32 1.0, %v909_v17  ;;  %v1234_v48 = vpop.eup %1233  ;;  %v874_v50 = vand.u32 2147483648, %v1854_v28  ;;  %1237 = vrcp.f32 %v1878_v20  ;;  %vm945_vm9 = vmor %vm943_vm14, %vm944_vm4 }
 0x309   : > { %v881_v39 = vmul.f32 %v1228_v46, %v880_v22  ;;  %v940_v45 = vsub.f32 1.0, %v939_v35  ;;  %v864_v56 = vmul.f32 %v1234_v48, %v1854_v28  ;;  %vm898_vm8 = vweird.f32 %v1856_v51 }
 0x30a   : > { %v852_v41 = vadd.f32 %v1226_v43, %v851_v37  ;;  %v911_v44 = vmul.f32 %v1230_v61, %v910_v38  ;;  %v1236_v57 = vpop.eup %1235  ;;  %v904_v1 = vand.u32 2147483648, %v1856_v51  ;;  %vm1928_vm11 = vcmp.eq.f32.partialorder %v872_v47, 8.507059e+37 }
 0x30b   : > { %v882_v49 = vadd.f32 %v1228_v46, %v881_v39  ;;  %v941_v55 = vmul.f32 %v1232_v12, %v940_v45  ;;  %v865_v34 = vsub.f32 1.0, %v864_v56  ;;  %v894_v16 = vmul.f32 %v1236_v57, %v1856_v51 }
 0x30c   : > { %v856_v53 = vsel %vm855_vm3, %v1226_v43, %v852_v41  ;;  %v912_v54 = vadd.f32 %v1230_v61, %v911_v44  ;;  %v875_v60 = vor.u32 1.1754944e-38, %v874_v50  ;;  %1239 = vrcp.f32 %v1880_v32 }
 0x30d   : > { %v861_v58 = vsel %vm1859_vm10, %v860_v15, %v856_v53  ;;  %v886_v0 = vsel %vm885_vm6, %v1228_v46, %v882_v49  ;;  %v942_v30 = vadd.f32 %v1232_v12, %v941_v55  ;;  %vm869_vm10 = vweird.f32 %v1234_v48 }
 0x30e   : > { %v891_v13 = vsel %vm1866_vm12, %v890_v63, %v886_v0  ;;  %v916_v14 = vsel %vm915_vm7, %v1230_v61, %v912_v54  ;;  %v968_v27 = vmul.f32 %v861_v58, %v1573_v9  ;;  %v1238_v42 = vpop.eup %1237  ;;  %v866_v26 = vmul.f32 %v1234_v48, %v865_v34 }
 0x30f   : > { %v921_v33 = vsel %vm1873_vm13, %v920_v19, %v916_v14  ;;  %v970_v29 = vmul.f32 %v891_v13, %v1564_v6  ;;  %v946_v21 = vsel %vm945_vm9, %v1232_v12, %v942_v30  ;;  %v895_v46 = vsub.f32 1.0, %v894_v16  ;;  %vm870_vm13 = vmor %vm868_vm5, %vm869_vm10 }
 0x310   : > { %v972_v23 = vmul.f32 %v921_v33, %v1558_v4  ;;  %v976_v24 = vadd.f32 %v968_v27, %v1573_v9  ;;  %v951_v31 = vsel %vm1884_vm0, %v950_v40, %v946_v21  ;;  %v924_v15 = vmul.f32 %v1238_v42, %v1878_v20 }
 0x311   : > { %v978_v43 = vadd.f32 %v970_v29, %v1564_v6  ;;  %v974_v25 = vmul.f32 %v951_v31, %v1554_v2  ;;  %v867_v6 = vadd.f32 %v1234_v48, %v866_v26  ;;  %v896_v59 = vmul.f32 %v1236_v57, %v895_v46 }
 0x312   : > { %v980_v52 = vadd.f32 %v972_v23, %v1558_v4  ;;  %984 = vst [vmem:[%s1925_s30] sm:$0xff] %v976_v24  ;;  %vm899_vm12 = vweird.f32 %v1236_v57  ;;  %v902_v4 = vand.u32 2147483647, %v1856_v51  ;;  %v925_v62 = vsub.f32 1.0, %v924_v15  ;;  %v1240_v36 = vpop.eup %1239 }
 0x313   : > { %986 = vst [vmem:[%s1925_s30 + $0x10] sm:$0xff] %v978_v43  ;;  %v982_v61 = vadd.f32 %v974_v25, %v1554_v2  ;;  %v871_v63 = vsel %vm870_vm13, %v1234_v48, %v867_v6  ;;  %v897_v8 = vadd.f32 %v1236_v57, %v896_v59  ;;  %v905_v11 = vor.u32 1.1754944e-38, %v904_v1  ;;  %vm900_vm14 = vmor %vm898_vm8, %vm899_vm12 }
 0x314   : > { %988 = vst [vmem:[%s1925_s30 + $0x20] sm:$0xff] %v980_v52  ;;  %v934_v17 = vand.u32 2147483648, %v1878_v20  ;;  %v876_v18 = vsel %vm1928_vm11, %v875_v60, %v871_v63  ;;  %v926_v2 = vmul.f32 %v1238_v42, %v925_v62  ;;  %vm929_vm15 = vweird.f32 %v1238_v42 }
 0x315   : > { %990 = vst [vmem:[%s1925_s30 + $0x30] sm:$0xff] %v982_v61  ;;  %v932_v28 = vand.u32 2147483647, %v1878_v20  ;;  %v901_v19 = vsel %vm900_vm14, %v1236_v57, %v897_v8  ;;  %vm903_vm0 = vcmp.eq.f32.partialorder %v902_v4, 8.507059e+37  ;;  %v969_v12 = vmul.f32 %v876_v18, %v1575_v10 }
 0x316   : > { %v906_v22 = vsel %vm903_vm0, %v905_v11, %v901_v19  ;;  %v927_v37 = vadd.f32 %v1238_v42, %v926_v2  ;;  %vm928_vm1 = vweird.f32 %v1878_v20  ;;  %v935_v38 = vor.u32 1.1754944e-38, %v934_v17 }
 0x317   : > { %vm930_vm2 = vmor %vm928_vm1, %vm929_vm15  ;;  %v971_v51 = vmul.f32 %v906_v22, %v1566_v7  ;;  %v977_v35 = vadd.f32 %v969_v12, %v1575_v10  ;;  %vm933_vm3 = vcmp.eq.f32.partialorder %v932_v28, 8.507059e+37  ;;  %v954_v41 = vmul.f32 %v1240_v36, %v1880_v32 }
 0x318   : > { %v931_v39 = vsel %vm930_vm2, %v1238_v42, %v927_v37  ;;  %v964_v20 = vand.u32 2147483648, %v1880_v32  ;;  %vm959_vm4 = vweird.f32 %v1240_v36  ;;  %v962_v49 = vand.u32 2147483647, %v1880_v32 }
 0x319   : > { %v936_v40 = vsel %vm933_vm3, %v935_v38, %v931_v39  ;;  %v979_v44 = vadd.f32 %v971_v51, %v1566_v7  ;;  %985 = vst [vmem:[%s1925_s30 + $0x8] sm:$0xff] %v977_v35  ;;  %v955_v47 = vsub.f32 1.0, %v954_v41  ;;  %vm958_vm5 = vweird.f32 %v1880_v32 }
 0x31a   : > { %v973_v45 = vmul.f32 %v936_v40, %v1562_v5  ;;  %vm960_vm6 = vmor %vm958_vm5, %vm959_vm4  ;;  %v965_v50 = vor.u32 1.1754944e-38, %v964_v20  ;;  %vm963_vm7 = vcmp.eq.f32.partialorder %v962_v49, 8.507059e+37 }
 0x31b   : > { %987 = vst [vmem:[%s1925_s30 + $0x18] sm:$0xff] %v979_v44  ;;  %v956_v48 = vmul.f32 %v1240_v36, %v955_v47 }
 0x31c   : > { %v981_v10 = vadd.f32 %v973_v45, %v1562_v5 }
 0x31d   : > { %v957_v7 = vadd.f32 %v1240_v36, %v956_v48 }
 0x31e   : > { %989 = vst [vmem:[%s1925_s30 + $0x28] sm:$0xff] %v981_v10 }
 0x31f   : > { %v961_v53 = vsel %vm960_vm6, %v1240_v36, %v957_v7 }
 0x320   : > { %v966_v5 = vsel %vm963_vm7, %v965_v50, %v961_v53 }
 0x321   : > { %v975_v54 = vmul.f32 %v966_v5, %v1556_v3 }
 0x323   : > { %v983_v55 = vadd.f32 %v975_v54, %v1556_v3 }
 0x325   : > { %991 = vst [vmem:[%s1925_s30 + $0x38] sm:$0xff] %v983_v55 }
 0x326   : > { %1328 = shalt.err (!%p1325_p10)
}
 0x327   : > { %s1385_s22 = smov 256   ;;  %s1386_s30 = smov 16  }
 0x328   : > { %1140 = dma.vmem_to_hbm [thread:$0]  (%p1512_p7), %s1006_s9, 1024, %s1008_s20, %s993_s12, %s1385_s22, %s1385_s22, %s1386_s30  }
 0x329 PF: > { %s1022_s13 = sand.u32 1, %s1359_s15   ;;  %p2030_p12 = scmp.ge.s32.totalorder %s1371_s18, 2 }
 0x32a   : > { %s1023_s17 = scalar_lea.sflag [#allocation5], %s1022_s13 }
 0x32b   : > { %p1151_p13 = pnand %p2030_p12, %p1480_p6 }
 0x32d   : > { %p1152_p0 = pneg %p1151_p13 }
 0x32f   : > { %1354 = dma.done.wait (%p1152_p0), %s1023_s17, 1024  }
 0x330   : > { %1356 = vsyncadd (%p1152_p0), %s1023_s17, 4294966272  ;;  %s2031_s23 = sld [smem:[#allocation12_spill]]  ;;  %p26_p3 = scmp.ge.s32.totalorder %s1498_s28, 4  }
 0x331   : > { %s2032_s17 = sld [smem:[#allocation13_spill]]  ;;  %s2033_s15 = smov %s1363_s16 }
 0x332   : > { %s2035_s18 = smov %s1498_s28  ;;  %28 = sbr.rel (!%p26_p3) target bundleno = 9 (0x9), region = 116 }
 0x336   : > { %s2034_s16 = smov %s2031_s23 }
 0x337   :  { %1029 = vsyncpa [#allocation4], 1 }
 0x338   :  { %1031 = vsyncpa [#allocation4 + $0x1], 1 }
 0x339   :  { %1032 = vsyncpa [#allocation7], 1 }
 0x33a   :  { %1033 = vsyncpa [#allocation5], 1 }
 0x33b   :  { %1035 = vsyncpa [#allocation5 + $0x1], 1 }

</bundles_post_ra>
